<compile_context>
chip_gen: v7x
topology: tpu7x:2x2x1
jax: 0.10.0
libtpu: 0.0.40
codegen_flags: <defaults>
</compile_context>

<pallas_src>
import functools
import math

import jax
import jax.numpy as jnp
from jax.experimental import pallas as pl
from jax.experimental.pallas import tpu as pltpu

HIDDEN = 128  # fixed by the module: nn.Linear(embed_dim, 128)


def _round_up(n: int, m: int) -> int:
    return ((n + m - 1) // m) * m


def _mil_attention_kernel(s_valid, x_ref, w1_ref, b1_ref, w2_ref, b2_ref,
                          z_ref, att_ref):
    """One bag tile: x (bt, S, E) -> z slab (bt*H, E), att slab (bt*H, S)."""
    bt, s, e = x_ref.shape
    h_dim = w2_ref.shape[1]

    # Full f32 MXU precision for f32 inputs (keeps 1e-5 tolerance at large
    # E / S accumulation depth); bf16 inputs stay native bf16 x bf16 -> f32.
    prec = (jax.lax.Precision.HIGHEST if x_ref.dtype == jnp.float32
            else jax.lax.Precision.DEFAULT)

    x = x_ref[...]                                   # (bt, S, E), native dtype
    x2 = x.reshape(bt * s, e)                        # free view: S % 8 == 0

    # Linear(E, 128) + tanh on the flattened slab (weights-stationary GEMM).
    hid = jnp.tanh(
        jnp.dot(x2, w1_ref[...], preferred_element_type=jnp.float32,
                precision=prec)
        + b1_ref[...])                               # (bt*S, 128) f32

    # Linear(128, H): per-instance, per-head scores. (w2/b2 are tiny; casting
    # them to f32 matches hid's dtype without touching the big operands.)
    scores = (jnp.dot(hid, w2_ref[...].astype(jnp.float32),
                      preferred_element_type=jnp.float32, precision=prec)
              + b2_ref[...].astype(jnp.float32))      # (bt*S, H) f32

    # Regroup to the bag-major (bt*H, S) slab the outputs are stored in (the
    # XLU relayout is on a small f32 tile and overlaps with MXU/VPU work).
    scores_t = jnp.transpose(scores.reshape(bt, s, h_dim),
                             (0, 2, 1)).reshape(bt * h_dim, s)

    # Padded instance columns get -inf so they receive zero attention weight.
    if s_valid != s:
        col = jax.lax.broadcasted_iota(jnp.int32, (1, s), 1)
        scores_t = jnp.where(col < s_valid, scores_t, -jnp.inf)

    # Softmax over S, lane-wise on the sublane-dense slab.
    m = jnp.max(scores_t, axis=-1, keepdims=True)
    ex = jnp.exp(scores_t - m)
    denom = jnp.sum(ex, axis=-1, keepdims=True)
    att = ex * pl.reciprocal(denom, approx=False)     # (bt*H, S) f32

    # Weighted pooling z[b, h, :] = sum_s att[b, h, s] * x[b, s, :].
    att3 = att.reshape(bt, h_dim, s)
    if h_dim <= 8:
        # Tiny-M batched matmuls are RHS-reload bound on the MXU; do the
        # pooling on the VPU instead (broadcast-multiply + reduce over S).
        zs = [jnp.sum(att3[:, h, :][:, :, None] * x, axis=1)   # (bt, E) f32
              for h in range(h_dim)]
        z = jnp.stack(zs, axis=1)                              # (bt, H, E)
    else:
        z = jax.lax.dot_general(
            att3, x.astype(jnp.float32),
            dimension_numbers=(((2,), (1,)), ((0,), (0,))),
            preferred_element_type=jnp.float32, precision=prec)

    att_ref[...] = att.astype(att_ref.dtype)
    z_ref[...] = z.reshape(bt * h_dim, e).astype(z_ref.dtype)


def _vmem_info():
    """Returns (per-step working-set budget, physical VMEM capacity) in bytes."""
    try:
        cap = int(pltpu.get_tpu_info().vmem_capacity_bytes)
    except Exception:
        cap = 64 * 2**20          # conservative fallback: v7x per-core VMEM
    # ~70% of physical VMEM for the per-step working set (v7x 64 MiB -> ~45 MiB,
    # v5e/v6e 128 MiB -> capped at 100 MiB), leaving headroom for Mosaic scratch.
    return int(min(cap * 0.7, 100 * 2**20)), cap


def _per_step_bytes(bt, s, e, h, in_item, out_item):
    """Estimated VMEM working set for one grid step with a `bt`-bag tile."""
    h8 = max(h, 8)
    x_tile   = 2 * bt * s * e * in_item                        # double-buffered input
    weights  = 2 * (e * HIDDEN + HIDDEN + HIDDEN * h + h) * 4  # double-buffered params
    hid      = bt * s * HIDDEN * 4                             # (bt*S, 128) f32
    scores   = bt * s * 128 * 4                                # (bt*S, H) lane-padded
    softmax  = 3 * bt * h8 * s * 4                             # scores_t / exp / att
    pool_tmp = bt * s * e * 4 if h <= 8 else bt * h8 * s * 4   # VPU pooling product
    z_out    = 2 * bt * h * e * out_item                       # double-buffered output
    att_out  = 2 * bt * h * s * out_item
    return x_tile + weights + hid + scores + softmax + pool_tmp + z_out + att_out


def _choose_tiling(B, s_pad, E, H, in_item, out_item):
    """Pick bags-per-step `bt` (sublane-aligned) and a matching VMEM limit."""
    unit = 8 // math.gcd(H, 8)          # bt*H multiple of 8 -> sublane-dense slabs
    budget, cap = _vmem_info()
    fixed = 2 * (E * HIDDEN + HIDDEN + HIDDEN * H + H) * 4
    per_bag = _per_step_bytes(1, s_pad, E, H, in_item, out_item) - fixed
    bt = max(unit, ((budget - fixed) // max(per_bag, 1)) // unit * unit)
    bt = min(bt, _round_up(B, unit))
    # Keep >=2 (ideally >=4) grid steps when the batch allows it: the pipeline
    # needs a next block to prefetch and v7x megacore shards the batch axis.
    if B >= 4 * unit:
        bt = min(bt, _round_up(-(-B // 4), unit))
    elif B >= 2 * unit:
        bt = min(bt, _round_up(-(-B // 2), unit))
    bt = max(unit, bt)
    footprint = _per_step_bytes(bt, s_pad, E, H, in_item, out_item)
    vmem_limit = int(min(max(int(footprint * 1.2), 32 * 2**20), int(cap * 0.92)))
    return bt, vmem_limit


def mil_attention(x, w1, b1, w2, b2):
    """x: (B, S, E). Returns (z: (B, H, E), att: (B, H, S))."""
    B, S, E = x.shape
    H = w2.shape[1]
    in_item = jnp.dtype(x.dtype).itemsize
    out_item = in_item

    # Pad S to a sublane-friendly size; go all the way to a multiple of 128
    # (lane-dense att stores, free flatten) when the extra padding is cheap.
    s_pad = _round_up(S, 8)
    s128 = _round_up(S, 128)
    if s128 <= max(int(S * 1.25), S + 7):
        s_pad = s128

    bt, vmem_limit = _choose_tiling(B, s_pad, E, H, in_item, out_item)
    b_pad = _round_up(B, bt)

    if b_pad != B or s_pad != S:
        x = jnp.pad(x, ((0, b_pad - B), (0, s_pad - S), (0, 0)))

    b1_2d = b1.reshape(1, HIDDEN)
    b2_2d = b2.reshape(1, H)
    grid = (b_pad // bt,)

    flops = 2 * b_pad * s_pad * (E * HIDDEN + HIDDEN * H + H * E)
    transcendentals = b_pad * s_pad * (HIDDEN + H)
    bytes_accessed = (in_item * b_pad * s_pad * E
                      + 4 * (E * HIDDEN + HIDDEN + HIDDEN * H + H)
                      + out_item * b_pad * H * (E + s_pad))

    grid_spec = pltpu.PrefetchScalarGridSpec(
        num_scalar_prefetch=0,
        grid=grid,
        in_specs=[
            pl.BlockSpec((bt, s_pad, E), lambda b: (b, 0, 0)),   # x bag tile
            pl.BlockSpec((E, HIDDEN), lambda b: (0, 0)),         # w1
            pl.BlockSpec((1, HIDDEN), lambda b: (0, 0)),         # b1
            pl.BlockSpec((HIDDEN, H), lambda b: (0, 0)),         # w2
            pl.BlockSpec((1, H), lambda b: (0, 0)),              # b2
        ],
        out_specs=[
            pl.BlockSpec((bt * H, E), lambda b: (b, 0)),         # z slab
            pl.BlockSpec((bt * H, s_pad), lambda b: (b, 0)),     # att slab
        ],
    )

    kernel = functools.partial(_mil_attention_kernel, S)

    z_flat, att_flat = pl.pallas_call(
        kernel,
        grid_spec=grid_spec,
        out_shape=(
            jax.ShapeDtypeStruct((b_pad * H, E), x.dtype),
            jax.ShapeDtypeStruct((b_pad * H, s_pad), x.dtype),
        ),
        compiler_params=pltpu.CompilerParams(
            dimension_semantics=("parallel",),
            vmem_limit_bytes=vmem_limit),
        cost_estimate=pl.CostEstimate(
            flops=flops,
            transcendentals=transcendentals,
            bytes_accessed=bytes_accessed),
    )(x, w1, b1_2d, w2, b2_2d)

    # Layout plumbing only: free reshapes back to (B, H, *), drop padding.
    z = z_flat.reshape(b_pad, H, E)[:B]
    att = att_flat.reshape(b_pad, H, s_pad)[:B, :, :S]
    return z, att


def mil_attention_ref(x, w1, b1, w2, b2):
    """Pure-JAX reference matching the PyTorch forward."""
    att = jnp.tanh(x @ w1 + b1) @ w2 + b2            # (B, S, H)
    att = jnp.swapaxes(att, -1, -2)                  # (B, H, S)
    att = jax.nn.softmax(att, axis=-1)
    z = att @ x                                      # (B, H, E)
    return z, att


if __name__ == "__main__":
    B, S, E, H = 2, 8, 32, 4

    key = jax.random.PRNGKey(0)
    kx, kw1, kb1, kw2, kb2 = jax.random.split(key, 5)
    x = jax.random.normal(kx, (B, S, E), dtype=jnp.float32)
    # Deterministic synthetic params (shapes from nn.Linear(E,128), nn.Linear(128,H)).
    w1 = jax.random.normal(kw1, (E, HIDDEN), dtype=jnp.float32) * 0.05
    b1 = jax.random.normal(kb1, (HIDDEN,), dtype=jnp.float32) * 0.05
    w2 = jax.random.normal(kw2, (HIDDEN, H), dtype=jnp.float32) * 0.05
    b2 = jax.random.normal(kb2, (H,), dtype=jnp.float32) * 0.05

    z, att = jax.block_until_ready(mil_attention(x, w1, b1, w2, b2))

    z_ref, att_ref = mil_attention_ref(x, w1, b1, w2, b2)
    assert jnp.allclose(z, z_ref, atol=1e-5, rtol=1e-5)
    assert jnp.allclose(att, att_ref, atol=1e-5, rtol=1e-5)

    print("KERNEL_OK")
</pallas_src>

<mosaic_0001>
module attributes {stable_mosaic.version = 11 : i64} {
  func.func @_mil_attention_kernel(%arg0: i32, %arg1: memref<2x8x32xf32, #tpu.memory_space<vmem>>, %arg2: memref<32x128xf32, #tpu.memory_space<vmem>>, %arg3: memref<1x128xf32, #tpu.memory_space<vmem>>, %arg4: memref<128x4xf32, #tpu.memory_space<vmem>>, %arg5: memref<1x4xf32, #tpu.memory_space<vmem>>, %arg6: memref<8x32xf32, #tpu.memory_space<vmem>>, %arg7: memref<8x8xf32, #tpu.memory_space<vmem>>) attributes {dimension_semantics = [#tpu.dimension_semantics<parallel>], iteration_bounds = array<i64: 1>, scalar_prefetch = 0 : i64, scratch_operands = 0 : i64, tpu.core_type = #tpu.core_type<tc>, window_params = [{transform_indices = @transform_0, window_bounds = array<i64: 2, 8, 32>}, {pipeline_mode = #tpu.pipeline_mode<synchronous>, transform_indices = @transform_1, window_bounds = array<i64: 32, 128>}, {pipeline_mode = #tpu.pipeline_mode<synchronous>, transform_indices = @transform_2, window_bounds = array<i64: 1, 128>}, {pipeline_mode = #tpu.pipeline_mode<synchronous>, transform_indices = @transform_3, window_bounds = array<i64: 128, 4>}, {pipeline_mode = #tpu.pipeline_mode<synchronous>, transform_indices = @transform_4, window_bounds = array<i64: 1, 4>}, {transform_indices = @transform_5, window_bounds = array<i64: 8, 32>}, {transform_indices = @transform_6, window_bounds = array<i64: 8, 8>}]} {
    %c0 = arith.constant 0 : index
    %c0_0 = arith.constant 0 : index
    %c0_1 = arith.constant 0 : index
    %0 = vector.load %arg1[%c0, %c0_0, %c0_1] : memref<2x8x32xf32, #tpu.memory_space<vmem>>, vector<2x8x32xf32>
    %1 = vector.shape_cast %0 : vector<2x8x32xf32> to vector<16x32xf32>
    %c0_2 = arith.constant 0 : index
    %c0_3 = arith.constant 0 : index
    %2 = vector.load %arg2[%c0_2, %c0_3] : memref<32x128xf32, #tpu.memory_space<vmem>>, vector<32x128xf32>
    %cst = arith.constant dense<0.000000e+00> : vector<16x128xf32>
    %3 = tpu.matmul %1, %2, %cst {dimension_numbers = #tpu.dot_dimension_numbers<[1], [0], [0], [1], [0, 0, 1, 1], [], []>, precision = #tpu.contract_precision<fp32>} : vector<16x32xf32>, vector<32x128xf32>, vector<16x128xf32> -> vector<16x128xf32>
    %c0_4 = arith.constant 0 : index
    %c0_5 = arith.constant 0 : index
    %4 = vector.load %arg3[%c0_4, %c0_5] : memref<1x128xf32, #tpu.memory_space<vmem>>, vector<1x128xf32>
    %5 = vector.broadcast %4 : vector<1x128xf32> to vector<16x128xf32>
    %6 = arith.addf %3, %5 : vector<16x128xf32>
    %7 = math.tanh %6 : vector<16x128xf32>
    %c0_6 = arith.constant 0 : index
    %c0_7 = arith.constant 0 : index
    %8 = vector.load %arg4[%c0_6, %c0_7] : memref<128x4xf32, #tpu.memory_space<vmem>>, vector<128x4xf32>
    %cst_8 = arith.constant dense<0.000000e+00> : vector<16x4xf32>
    %9 = tpu.matmul %7, %8, %cst_8 {dimension_numbers = #tpu.dot_dimension_numbers<[1], [0], [0], [1], [0, 0, 1, 1], [], []>, precision = #tpu.contract_precision<fp32>} : vector<16x128xf32>, vector<128x4xf32>, vector<16x4xf32> -> vector<16x4xf32>
    %c0_9 = arith.constant 0 : index
    %c0_10 = arith.constant 0 : index
    %10 = vector.load %arg5[%c0_9, %c0_10] : memref<1x4xf32, #tpu.memory_space<vmem>>, vector<1x4xf32>
    %11 = vector.broadcast %10 : vector<1x4xf32> to vector<16x4xf32>
    %12 = arith.addf %9, %11 : vector<16x4xf32>
    %13 = vector.shape_cast %12 : vector<16x4xf32> to vector<2x8x4xf32>
    %14 = tpu.transpose %13, [0, 2, 1] : vector<2x8x4xf32> -> vector<2x4x8xf32>
    %15 = vector.shape_cast %14 : vector<2x4x8xf32> to vector<8x8xf32>
    %cst_11 = arith.constant dense<0xFF800000> : vector<8xf32>
    %16 = vector.multi_reduction <maximumf>, %15, %cst_11 [1] : vector<8x8xf32> to vector<8xf32>
    %17 = vector.shape_cast %16 : vector<8xf32> to vector<8x1xf32>
    %18 = vector.broadcast %17 : vector<8x1xf32> to vector<8x8xf32>
    %19 = arith.subf %15, %18 : vector<8x8xf32>
    %20 = math.exp %19 : vector<8x8xf32>
    %cst_12 = arith.constant dense<0.000000e+00> : vector<8xf32>
    %21 = vector.multi_reduction <add>, %20, %cst_12 [1] : vector<8x8xf32> to vector<8xf32>
    %22 = vector.shape_cast %21 : vector<8xf32> to vector<8x1xf32>
    %23 = tpu.reciprocal %22 : vector<8x1xf32> -> vector<8x1xf32>
    %24 = vector.broadcast %23 : vector<8x1xf32> to vector<8x8xf32>
    %25 = arith.mulf %20, %24 : vector<8x8xf32>
    %26 = vector.shape_cast %25 : vector<8x8xf32> to vector<2x4x8xf32>
    %27 = vector.extract_strided_slice %26 {offsets = [0, 0, 0], sizes = [2, 1, 8], strides = [1, 1, 1]} : vector<2x4x8xf32> to vector<2x1x8xf32>
    %28 = vector.shape_cast %27 : vector<2x1x8xf32> to vector<2x8xf32>
    %29 = vector.shape_cast %28 : vector<2x8xf32> to vector<2x8x1xf32>
    %30 = vector.broadcast %29 : vector<2x8x1xf32> to vector<2x8x32xf32>
    %31 = arith.mulf %30, %0 : vector<2x8x32xf32>
    %cst_13 = arith.constant dense<0.000000e+00> : vector<2x32xf32>
    %32 = vector.multi_reduction <add>, %31, %cst_13 [1] : vector<2x8x32xf32> to vector<2x32xf32>
    %33 = vector.extract_strided_slice %26 {offsets = [0, 1, 0], sizes = [2, 1, 8], strides = [1, 1, 1]} : vector<2x4x8xf32> to vector<2x1x8xf32>
    %34 = vector.shape_cast %33 : vector<2x1x8xf32> to vector<2x8xf32>
    %35 = vector.shape_cast %34 : vector<2x8xf32> to vector<2x8x1xf32>
    %36 = vector.broadcast %35 : vector<2x8x1xf32> to vector<2x8x32xf32>
    %37 = arith.mulf %36, %0 : vector<2x8x32xf32>
    %cst_14 = arith.constant dense<0.000000e+00> : vector<2x32xf32>
    %38 = vector.multi_reduction <add>, %37, %cst_14 [1] : vector<2x8x32xf32> to vector<2x32xf32>
    %39 = vector.extract_strided_slice %26 {offsets = [0, 2, 0], sizes = [2, 1, 8], strides = [1, 1, 1]} : vector<2x4x8xf32> to vector<2x1x8xf32>
    %40 = vector.shape_cast %39 : vector<2x1x8xf32> to vector<2x8xf32>
    %41 = vector.shape_cast %40 : vector<2x8xf32> to vector<2x8x1xf32>
    %42 = vector.broadcast %41 : vector<2x8x1xf32> to vector<2x8x32xf32>
    %43 = arith.mulf %42, %0 : vector<2x8x32xf32>
    %cst_15 = arith.constant dense<0.000000e+00> : vector<2x32xf32>
    %44 = vector.multi_reduction <add>, %43, %cst_15 [1] : vector<2x8x32xf32> to vector<2x32xf32>
    %45 = vector.extract_strided_slice %26 {offsets = [0, 3, 0], sizes = [2, 1, 8], strides = [1, 1, 1]} : vector<2x4x8xf32> to vector<2x1x8xf32>
    %46 = vector.shape_cast %45 : vector<2x1x8xf32> to vector<2x8xf32>
    %47 = vector.shape_cast %46 : vector<2x8xf32> to vector<2x8x1xf32>
    %48 = vector.broadcast %47 : vector<2x8x1xf32> to vector<2x8x32xf32>
    %49 = arith.mulf %48, %0 : vector<2x8x32xf32>
    %cst_16 = arith.constant dense<0.000000e+00> : vector<2x32xf32>
    %50 = vector.multi_reduction <add>, %49, %cst_16 [1] : vector<2x8x32xf32> to vector<2x32xf32>
    %51 = vector.shape_cast %32 : vector<2x32xf32> to vector<2x1x32xf32>
    %52 = vector.shape_cast %38 : vector<2x32xf32> to vector<2x1x32xf32>
    %53 = vector.shape_cast %44 : vector<2x32xf32> to vector<2x1x32xf32>
    %54 = vector.shape_cast %50 : vector<2x32xf32> to vector<2x1x32xf32>
    %55 = tpu.concatenate %51, %52, %53, %54 in 1 : vector<2x1x32xf32>, vector<2x1x32xf32>, vector<2x1x32xf32>, vector<2x1x32xf32> -> vector<2x4x32xf32>
    %c0_17 = arith.constant 0 : index
    %c0_18 = arith.constant 0 : index
    %56 = vector.load %arg7[%c0_17, %c0_18] : memref<8x8xf32, #tpu.memory_space<vmem>>, vector<8x8xf32>
    tpu.vector_store %arg7[%c0_17, %c0_18], %25 {strides = array<i32>} : memref<8x8xf32, #tpu.memory_space<vmem>>, vector<8x8xf32>,
    %57 = vector.shape_cast %55 : vector<2x4x32xf32> to vector<8x32xf32>
    %c0_19 = arith.constant 0 : index
    %c0_20 = arith.constant 0 : index
    %58 = vector.load %arg6[%c0_19, %c0_20] : memref<8x32xf32, #tpu.memory_space<vmem>>, vector<8x32xf32>
    tpu.vector_store %arg6[%c0_19, %c0_20], %57 {strides = array<i32>} : memref<8x32xf32, #tpu.memory_space<vmem>>, vector<8x32xf32>,
    return
  }
  func.func @transform_0(%arg0: i32) -> (i32, i32, i32) {
    %c0_i32 = arith.constant 0 : i32
    %c0_i32_0 = arith.constant 0 : i32
    %c0_i32_1 = arith.constant 0 : i32
    return %arg0, %c0_i32, %c0_i32_0 : i32, i32, i32
  }
  func.func @transform_1(%arg0: i32) -> (i32, i32) {
    %c0_i32 = arith.constant 0 : i32
    %c0_i32_0 = arith.constant 0 : i32
    %c0_i32_1 = arith.constant 0 : i32
    return %c0_i32, %c0_i32_0 : i32, i32
  }
  func.func @transform_2(%arg0: i32) -> (i32, i32) {
    %c0_i32 = arith.constant 0 : i32
    %c0_i32_0 = arith.constant 0 : i32
    %c0_i32_1 = arith.constant 0 : i32
    return %c0_i32, %c0_i32_0 : i32, i32
  }
  func.func @transform_3(%arg0: i32) -> (i32, i32) {
    %c0_i32 = arith.constant 0 : i32
    %c0_i32_0 = arith.constant 0 : i32
    %c0_i32_1 = arith.constant 0 : i32
    return %c0_i32, %c0_i32_0 : i32, i32
  }
  func.func @transform_4(%arg0: i32) -> (i32, i32) {
    %c0_i32 = arith.constant 0 : i32
    %c0_i32_0 = arith.constant 0 : i32
    %c0_i32_1 = arith.constant 0 : i32
    return %c0_i32, %c0_i32_0 : i32, i32
  }
  func.func @transform_5(%arg0: i32) -> (i32, i32) {
    %c0_i32 = arith.constant 0 : i32
    %c0_i32_0 = arith.constant 0 : i32
    return %arg0, %c0_i32 : i32, i32
  }
  func.func @transform_6(%arg0: i32) -> (i32, i32) {
    %c0_i32 = arith.constant 0 : i32
    %c0_i32_0 = arith.constant 0 : i32
    return %arg0, %c0_i32 : i32, i32
  }
}

</mosaic_0001>

<bundles_post_ra>
// kernel: tpu_custom_call.1
= control target key start
LH: loop header
LB: loop body
LE: loop exit
PB: predicated region body
PF: predicated region fallthrough
CT: control target
= control target key end

     0   :  { %12 = vsyncpa [#allocation3], 0  ;;  %vm37_vm0 = vcmask 261120   ;;  %s2800_s0 = inlined_call_operand.vmem [shape: f32[2,8,32], index: 0, kind: input, shape index: {}]   ;;  %s2801_s1 = inlined_call_operand.vmem [shape: f32[32,128], index: 1, kind: input, shape index: {}]   ;;  %s2802_s2 = inlined_call_operand.vmem [shape: f32[1,128], index: 2, kind: input, shape index: {}]   ;;  %s2803_s3 = inlined_call_operand.vmem [shape: f32[128,4], index: 3, kind: input, shape index: {}]   ;;  %s2804_s4 = inlined_call_operand.vmem [shape: f32[1,4], index: 4, kind: input, shape index: {}]   ;;  %s2805_s5 = inlined_call_operand.hbm [shape: f32[8,32], index: 5, kind: output, shape index: {0}]   ;;  %s2806_s6 = inlined_call_operand.hbm [shape: f32[8,8], index: 6, kind: output, shape index: {1}]  }
   0x1   :  { %v26_v0 = vld [vmem:[%s2801_s1] sm:$0xff]  ;;  %v27_v1 = vld [vmem:[%s2801_s1 + $0x8] sm:$0xff]  ;;  %v28_v2 = vld [vmem:[%s2801_s1 + $0x10] sm:$0xff] }
   0x2   :  { %v45_v3 = vand.u32 4294901760, %v26_v0  ;;  %v48_v4 = vand.u32 4294901760, %v27_v1  ;;  %v29_v5 = vld [vmem:[%s2801_s1 + $0x18] sm:$0xff]  ;;  %v51_v6 = vand.u32 4294901760, %v28_v2  ;;  %v2373_v7 = vld [vmem:[%s2800_s0] sm:$0xff]  ;;  %v2378_v8 = vld [vmem:[%s2800_s0 + $0x8] sm:$0xff] }
   0x3   :  { %v54_v9 = vand.u32 4294901760, %v29_v5  ;;  %v39_v10 = vsel %vm37_vm0, %v2373_v7, 0  ;;  %v42_v11 = vsel %vm37_vm0, %v2378_v8, 0  ;;  %v2403_v20 = vld [vmem:[%s2803_s3] sm:$0xff] }
   0x4   :  { %v2384_v12 = vpack.c.bf16 %v48_v4, %v45_v3  ;;  %v2386_v13 = vand.u32 4294901760, %v39_v10  ;;  %v2388_v14 = vand.u32 4294901760, %v42_v11  ;;  %v2390_v15 = vsub.f32 %v26_v0, %v45_v3 }
   0x5   :  { %v2392_v16 = vpack.c.bf16 %v54_v9, %v51_v6  ;;  %v2394_v17 = vsub.f32 %v27_v1, %v48_v4  ;;  %v2396_v18 = vsub.f32 %v28_v2, %v51_v6  ;;  %v2398_v19 = vsub.f32 %v29_v5, %v54_v9 }
   0x6   :  { %1993 = vmatprep.subr.bf16.mxu0 %v2384_v12  ;;  %v2407_v21 = vsub.f32 %v39_v10, %v2386_v13  ;;  %v2410_v22 = vsub.f32 %v42_v11, %v2388_v14  ;;  %v136_v23 = vand.u32 4294901760, %v2390_v15 }
   0x7   :  { %13 = vsyncpa [#allocation5], 0  ;;  %1995 = vmatpush3.bf16.msra.mxu0 %v2384_v12  ;;  %v143_v24 = vand.u32 4294901760, %v2394_v17  ;;  %v150_v25 = vand.u32 4294901760, %v2396_v18  ;;  %v157_v26 = vand.u32 4294901760, %v2398_v19  ;;  %v2426_v30 = vld [vmem:[%s2803_s3 + $0x8] sm:$0xff]  ;;  %v2008_v63 = vpack.c.bf16 %v2394_v17, %v2390_v15 }
   0x8   :  { %1997 = vmatprep.subr.bf16.mxu0 %v2392_v16  ;;  %v115_v27 = vand.u32 4294901760, %v2407_v21  ;;  %v125_v28 = vand.u32 4294901760, %v2410_v22  ;;  %v137_v29 = vsub.f32 %v2390_v15, %v136_v23  ;;  %v598_v31 = vand.u32 4294901760, %v2403_v20  ;;  %v2441_v35 = vld [vmem:[%s2803_s3 + $0x10] sm:$0xff]  ;;  %v2452_v39 = vld [vmem:[%s2803_s3 + $0x18] sm:$0xff]  ;;  %v2459_v44 = vld [vmem:[%s2803_s3 + $0x20] sm:$0xff] }
   0x9   :  { %v144_v32 = vsub.f32 %v2394_v17, %v143_v24  ;;  %v151_v33 = vsub.f32 %v2396_v18, %v150_v25  ;;  %v158_v34 = vsub.f32 %v2398_v19, %v157_v26  ;;  %v601_v43 = vand.u32 4294901760, %v2426_v30  ;;  %v2464_v45 = vld [vmem:[%s2803_s3 + $0x28] sm:$0xff]  ;;  %v2475_v50 = vld [vmem:[%s2803_s3 + $0x30] sm:$0xff]  ;;  %v2480_v51 = vld [vmem:[%s2803_s3 + $0x38] sm:$0xff] }
   0xa   :  { %v116_v36 = vsub.f32 %v2407_v21, %v115_v27  ;;  %v126_v37 = vsub.f32 %v2410_v22, %v125_v28  ;;  %v138_v38 = vand.u32 4294901760, %v137_v29  ;;  %v2469_v48 = vsub.f32 %v2403_v20, %v598_v31 }
   0xb   :  { %1999 = vmatpush3.bf16.msra.mxu0 %v2392_v16  ;;  %v145_v40 = vand.u32 4294901760, %v144_v32  ;;  %v152_v41 = vand.u32 4294901760, %v151_v33  ;;  %v159_v42 = vand.u32 4294901760, %v158_v34  ;;  %v604_v49 = vand.u32 4294901760, %v2441_v35  ;;  %v587_v32 = vld [vmem:[%s2803_s3 + $0x68] sm:$0xff]  ;;  %v588_v33 = vld [vmem:[%s2803_s3 + $0x70] sm:$0xff] }
   0xc   :  { %v117_v46 = vand.u32 4294901760, %v116_v36  ;;  %v127_v47 = vand.u32 4294901760, %v126_v37  ;;  %v2485_v54 = vsub.f32 %v2426_v30, %v601_v43  ;;  %v607_v55 = vand.u32 4294901760, %v2452_v39  ;;  %v589_v37 = vld [vmem:[%s2803_s3 + $0x78] sm:$0xff] }
   0xd   :  { %v2000_v52 = vpack.c.bf16 %v145_v40, %v138_v38  ;;  %v2004_v53 = vpack.c.bf16 %v159_v42, %v152_v41  ;;  %v2491_v56 = vsub.f32 %v2441_v35, %v604_v49  ;;  %v610_v57 = vand.u32 4294901760, %v2459_v44 }
   0xe   :  { %1724 = vmatprep.mubr.f32.mxu0 %v117_v46  ;;  %v613_v58 = vand.u32 4294901760, %v2464_v45  ;;  %v2104_v59 = vpack.c.bf16 %v2485_v54, %v2469_v48  ;;  %v616_v60 = vand.u32 4294901760, %v2475_v50  ;;  %v619_v61 = vand.u32 4294901760, %v2480_v51 }
   0xf   :  { %1725 = vmatmul.mubr.f32.vlgmr.msra.gmra.mrb[0].mxu0 %v127_v47  ;;  %2001 = vmatprep.subr.bf16.mxu0 %v2000_v52  ;;  %v2501_v62 = vsub.f32 %v2452_v39, %v607_v55  ;;  %v2506_v0 = vsub.f32 %v2459_v44, %v610_v57  ;;  %v2012_v6 = vpack.c.bf16 %v2398_v19, %v2396_v18  ;;  %v637_v36 = vand.u32 4294901760, %v587_v32 }
  0x10   :  { %2003 = vmatpush3.bf16.msra.mxu0 %v2000_v52  ;;  %1735 = vmatprep.mubr.f32.mxu0 %v2386_v13  ;;  %v2509_v1 = vsub.f32 %v2464_v45, %v613_v58  ;;  %v2516_v4 = vsub.f32 %v2475_v50, %v616_v60  ;;  %v2519_v5 = vsub.f32 %v2480_v51, %v619_v61  ;;  %v640_v38 = vand.u32 4294901760, %v588_v33 }
  0x11   :  { %2005 = vmatprep.subr.bf16.mxu0 %v2004_v53  ;;  %2105 = vmatprep.subr.bf16.mxu1 %v2104_v59  ;;  %v2108_v2 = vpack.c.bf16 %v2501_v62, %v2491_v56  ;;  %v2024_v10 = vpack.c.bf16 %v143_v24, %v136_v23  ;;  %v2028_v11 = vpack.c.bf16 %v157_v26, %v150_v25  ;;  %v585_v23 = vld [vmem:[%s2803_s3 + $0x58] sm:$0xff]  ;;  %v643_v39 = vand.u32 4294901760, %v589_v37 }
  0x12   :  { %2107 = vmatpush3.bf16.msra.mxu1 %v2104_v59  ;;  %v2112_v3 = vpack.c.bf16 %v2509_v1, %v2506_v0  ;;  %v2116_v9 = vpack.c.bf16 %v2519_v5, %v2516_v4  ;;  %v2554_v15 = vpack.c.bf16 %v601_v43, %v598_v31  ;;  %v2559_v17 = vpack.c.bf16 %v607_v55, %v604_v49  ;;  %v586_v31 = vld [vmem:[%s2803_s3 + $0x60] sm:$0xff] }
  0x13   :  { %2109 = vmatprep.subr.bf16.mxu1 %v2108_v2  ;;  %v631_v26 = vand.u32 4294901760, %v585_v23  ;;  %v634_v35 = vand.u32 4294901760, %v586_v31  ;;  %v791_v41 = vsub.f32 %v587_v32, %v637_v36  ;;  %v798_v43 = vsub.f32 %v588_v33, %v640_v38 }
  0x14   :  { %2007 = vmatpush3.bf16.msra.mxu0 %v2004_v53  ;;  %v805_v44 = vsub.f32 %v589_v37, %v643_v39  ;;  %v2620_v47 = vpack.c.bf16 %v643_v39, %v640_v38  ;;  %v701_v49 = vand.u32 4294901760, %v2469_v48  ;;  %v708_v50 = vand.u32 4294901760, %v2485_v54  ;;  %v1570_v38 = vld [vmem:[%s2802_s2] ss:$0 sm:$0xff] }
  0x15   :  { %2009 = vmatprep.subr.bf16.mxu0 %v2008_v63  ;;  %v784_v40 = vsub.f32 %v586_v31, %v634_v35  ;;  %v2616_v42 = vpack.c.bf16 %v637_v36, %v634_v35  ;;  %vm1349_vm1 = vcmask 64512  }
  0x16   :  { %2111 = vmatpush3.bf16.msra.mxu1 %v2108_v2  ;;  %v2132_v46 = vpack.c.bf16 %v805_v44, %v798_v43  ;;  %v702_v51 = vsub.f32 %v2469_v48, %v701_v49  ;;  %v709_v52 = vsub.f32 %v2485_v54, %v708_v50  ;;  %v2648_v32 = vpack.c.bf16 %v708_v50, %v701_v49 }
  0x17   :  { %1736 = vmatmul.mubr.f32.vlgmr.msra.gmra.mrb[0].mxu0 %v2388_v14  ;;  %2113 = vmatprep.subr.bf16.mxu1 %v2112_v3  ;;  %v2128_v45 = vpack.c.bf16 %v791_v41, %v784_v40 }
  0x18   :  { %2011 = vmatpush3.bf16.msra.mxu0 %v2008_v63  ;;  %1746 = vmatprep.mubr.f32.mxu0 %v2407_v21  ;;  %v703_v53 = vand.u32 4294901760, %v702_v51  ;;  %v710_v55 = vand.u32 4294901760, %v709_v52 }
  0x19   :  { %2013 = vmatprep.subr.bf16.mxu0 %v2012_v6 }
  0x1a   :  { %2115 = vmatpush3.bf16.msra.mxu1 %v2112_v3 }
  0x1b   :  { %2117 = vmatprep.subr.bf16.mxu1 %v2116_v9 }
  0x1c   :  { %2015 = vmatpush3.bf16.msra.mxu0 %v2012_v6 }
  0x1d   :  { %2017 = vmatprep.subr.bf16.mxu0 %v2384_v12 }
  0x1e   :  { %2119 = vmatpush3.bf16.msra.mxu1 %v2116_v9 }
  0x1f   :  { %1747 = vmatmul.mubr.f32.vlgmr.msra.gmra.mrb[0].mxu0 %v2410_v22  ;;  %v584_v22 = vld [vmem:[%s2803_s3 + $0x50] sm:$0xff] }
  0x20   :  { %2019 = vmatpush3.bf16.msra.mxu0 %v2384_v12  ;;  %1757 = vmatprep.mubr.f32.mxu0 %v115_v27  ;;  %v628_v25 = vand.u32 4294901760, %v584_v22 }
  0x21   :  { %2021 = vmatprep.subr.bf16.mxu0 %v2392_v16 }
  0x22   :  { %v2592_v27 = vsub.f32 %v584_v22, %v628_v25  ;;  %v2598_v30 = vpack.c.bf16 %v631_v26, %v628_v25 }
  0x24   :  { %2023 = vmatpush3.bf16.msra.mxu0 %v2392_v16  ;;  %v771_v48 = vand.u32 4294901760, %v2592_v27 }
  0x25   :  { %2025 = vmatprep.subr.bf16.mxu0 %v2024_v10 }
  0x26   :  { %v772_v6 = vsub.f32 %v2592_v27, %v771_v48 }
  0x27   :  { %1758 = vmatmul.mubr.f32.vlgmr.msra.gmra.mrb[0].mxu0 %v125_v28  ;;  %v2594_v28 = vsub.f32 %v585_v23, %v631_v26  ;;  %v799_v23 = vand.u32 4294901760, %v798_v43 }
  0x28   :  { %2027 = vmatpush3.bf16.msra.mxu0 %v2024_v10  ;;  %1768 = vmatprep.mubr.f32.mxu0 %v2386_v13  ;;  %v773_v10 = vand.u32 4294901760, %v772_v6 }
  0x29   :  { %2029 = vmatprep.subr.bf16.mxu0 %v2028_v11  ;;  %v2124_v34 = vpack.c.bf16 %v2594_v28, %v2592_v27  ;;  %v778_v54 = vand.u32 4294901760, %v2594_v28  ;;  %v800_v26 = vsub.f32 %v798_v43, %v799_v23 }
  0x2b   :  { %v779_v9 = vsub.f32 %v2594_v28, %v778_v54  ;;  %v801_v27 = vand.u32 4294901760, %v800_v26  ;;  %v2654_v35 = vpack.c.bf16 %v778_v54, %v771_v48 }
  0x2c   :  { %2031 = vmatpush3.bf16.msra.mxu0 %v2028_v11 }
  0x2d   :  { %2033 = vmatprep.subr.bf16.mxu0 %v2384_v12  ;;  %v780_v11 = vand.u32 4294901760, %v779_v9 }
  0x2f   :  { %1769 = vmatmul.mubr.f32.vlgmr.msra.gmra.mrb[0].mxu0 %v2388_v14 }
  0x30   :  { %2035 = vmatpush3.bf16.msra.mxu0 %v2384_v12  ;;  %1779 = vmatprep.mubr.f32.mxu0 %v2386_v13  ;;  %v2564_v12 = vpack.c.bf16 %v613_v58, %v610_v57  ;;  %v2568_v13 = vpack.c.bf16 %v619_v61, %v616_v60  ;;  %v2631_v57 = vpack.c.bf16 %v710_v55, %v703_v53  ;;  %v729_v55 = vand.u32 4294901760, %v2506_v0 }
  0x31   :  { %2037 = vmatprep.subr.bf16.mxu0 %v2392_v16 }
  0x32   :  { %v730_v54 = vsub.f32 %v2506_v0, %v729_v55 }
  0x34   :  { %2039 = vmatpush3.bf16.msra.mxu0 %v2392_v16  ;;  %v583_v16 = vld [vmem:[%s2803_s3 + $0x48] sm:$0xff] }
  0x35   :  { %2041 = vmatprep.subr.bf16.mxu0 %v2554_v15  ;;  %v625_v19 = vand.u32 4294901760, %v583_v16 }
  0x37   :  { %1780 = vmatmul.mubr.f32.vlgmr.msra.gmra.mrb[0].mxu0 %v2388_v14  ;;  %v582_v14 = vld [vmem:[%s2803_s3 + $0x40] sm:$0xff]  ;;  %v2582_v21 = vsub.f32 %v583_v16, %v625_v19  ;;  %v792_v16 = vand.u32 4294901760, %v791_v41 }
  0x38   :  { %2043 = vmatpush3.bf16.msra.mxu0 %v2554_v15  ;;  %v622_v18 = vand.u32 4294901760, %v582_v14 }
  0x39   :  { %2045 = vmatprep.subr.bf16.mxu0 %v2559_v17  ;;  %v764_v59 = vand.u32 4294901760, %v2582_v21 }
  0x3a   :  { %v2580_v20 = vsub.f32 %v582_v14, %v622_v18  ;;  %v2596_v29 = vpack.c.bf16 %v625_v19, %v622_v18  ;;  %v785_v14 = vand.u32 4294901760, %v784_v40  ;;  %v2644_v18 = vpack.c.bf16 %v780_v11, %v773_v10 }
  0x3b   :  { %v765_v61 = vsub.f32 %v2582_v21, %v764_v59  ;;  %v743_v10 = vand.u32 4294901760, %v2516_v4  ;;  %v750_v11 = vand.u32 4294901760, %v2519_v5 }
  0x3c   :  { %2047 = vmatpush3.bf16.msra.mxu0 %v2559_v17  ;;  %v2120_v24 = vpack.c.bf16 %v2582_v21, %v2580_v20  ;;  %v757_v58 = vand.u32 4294901760, %v2580_v20  ;;  %v786_v19 = vsub.f32 %v784_v40, %v785_v14  ;;  %v2656_v36 = vpack.c.bf16 %v792_v16, %v785_v14 }
  0x3d   :  { %2049 = vmatprep.subr.bf16.mxu0 %v2564_v12  ;;  %v766_v2 = vand.u32 4294901760, %v765_v61 }
  0x3e   :  { %2121 = vmatprep.subr.bf16.mxu1 %v2120_v24  ;;  %v758_v60 = vsub.f32 %v2580_v20, %v757_v58  ;;  %v793_v20 = vsub.f32 %v791_v41, %v792_v16  ;;  %v787_v21 = vand.u32 4294901760, %v786_v19 }
  0x3f   :  { %2123 = vmatpush3.bf16.msra.mxu1 %v2120_v24  ;;  %v806_v24 = vand.u32 4294901760, %v805_v44 }
  0x40   :  { %2051 = vmatpush3.bf16.msra.mxu0 %v2564_v12  ;;  %2125 = vmatprep.subr.bf16.mxu1 %v2124_v34  ;;  %v759_v63 = vand.u32 4294901760, %v758_v60  ;;  %v794_v22 = vand.u32 4294901760, %v793_v20  ;;  %v731_v20 = vand.u32 4294901760, %v730_v54 }
  0x41   :  { %2053 = vmatprep.subr.bf16.mxu0 %v2568_v13  ;;  %v807_v31 = vsub.f32 %v805_v44, %v806_v24  ;;  %v2658_v37 = vpack.c.bf16 %v806_v24, %v799_v23  ;;  %v715_v44 = vand.u32 4294901760, %v2491_v56  ;;  %v744_v23 = vsub.f32 %v2516_v4, %v743_v10 }
  0x42   :  { %v2640_v3 = vpack.c.bf16 %v766_v2, %v759_v63  ;;  %v2646_v25 = vpack.c.bf16 %v794_v22, %v787_v21  ;;  %v751_v24 = vsub.f32 %v2519_v5, %v750_v11 }
  0x43   :  { %2127 = vmatpush3.bf16.msra.mxu1 %v2124_v34  ;;  %v808_v28 = vand.u32 4294901760, %v807_v31  ;;  %v2652_v34 = vpack.c.bf16 %v764_v59, %v757_v58  ;;  %v716_v52 = vsub.f32 %v2491_v56, %v715_v44  ;;  %v736_v59 = vand.u32 4294901760, %v2509_v1 }
  0x44   :  { %2055 = vmatpush3.bf16.msra.mxu0 %v2568_v13  ;;  %2129 = vmatprep.subr.bf16.mxu1 %v2128_v45  ;;  %v745_v31 = vand.u32 4294901760, %v744_v23  ;;  %v2180_v56 = vpack.c.bf16 %v750_v11, %v743_v10 }
  0x45   :  { %2057 = vmatprep.subr.bf16.mxu0 %v2596_v29  ;;  %v2650_v33 = vpack.c.bf16 %v808_v28, %v801_v27  ;;  %v717_v2 = vand.u32 4294901760, %v716_v52  ;;  %v737_v9 = vsub.f32 %v2509_v1, %v736_v59  ;;  %v752_v27 = vand.u32 4294901760, %v751_v24  ;;  %v1571_v1 = vld [vmem:[%s2804_s4] ss:$0 sm:$0xff]  ;;  %s2321_s4 = smov [#allocation4]  }
  0x46   :  { %v1357_v28 = vlaneseq  ;;  %s1558_s15 = sshll.u32 %s2321_s4, 4  ;;  %s1559_s15 = int_to_ptr.vmem [resolvable:$true] %s1558_s15 }
  0x47   :  { %2131 = vmatpush3.bf16.msra.mxu1 %v2128_v45  ;;  %v722_v45 = vand.u32 4294901760, %v2501_v62  ;;  %v738_v22 = vand.u32 4294901760, %v737_v9  ;;  %v2084_v4 = vpack.c.bf16 %v752_v27, %v745_v31  ;;  %s2271_s16 = scalar_lea.vmem %s1559_s15, 128  ;;  %p2276_p1 = scmp.lt.s32.totalorder %s1559_s15, %s1559_s15 }
  0x48   :  { %2059 = vmatpush3.bf16.msra.mxu0 %v2596_v29  ;;  %2133 = vmatprep.subr.bf16.mxu1 %v2132_v46  ;;  %p2272_p0 = scmp.ne.s32.totalorder %s1559_s15, %s2271_s16  ;;  %p2277_p2 = scmp.lt.s32.totalorder %s2271_s16, %s2271_s16 }
  0x49   :  { %2061 = vmatprep.subr.bf16.mxu0 %v2598_v30  ;;  %v723_v53 = vsub.f32 %v2501_v62, %v722_v45  ;;  %v2080_v26 = vpack.c.bf16 %v738_v22, %v731_v20  ;;  %v2172_v5 = vpack.c.bf16 %v722_v45, %v715_v44 }
  0x4a   :  { %p2278_p3 = por %p2277_p2, %p2276_p1 }
  0x4b   :  { %2135 = vmatpush3.bf16.msra.mxu1 %v2132_v46  ;;  %v724_v48 = vand.u32 4294901760, %v723_v53 }
  0x4c   :  { %2063 = vmatpush3.bf16.msra.mxu0 %v2598_v30  ;;  %2137 = vmatprep.subr.bf16.mxu1 %v2554_v15  ;;  %p2279_p4 = pnand %p2278_p3, %p2272_p0 }
  0x4d   :  { %2065 = vmatprep.subr.bf16.mxu0 %v2616_v42  ;;  %v2076_v19 = vpack.c.bf16 %v724_v48, %v717_v2 }
  0x50   :  { %2067 = vmatpush3.bf16.msra.mxu0 %v2616_v42 }
  0x51   :  { %2069 = vmatprep.subr.bf16.mxu0 %v2620_v47 }
  0x54   :  { %2071 = vmatpush3.bf16.msra.mxu0 %v2620_v47 }
  0x55   :  { %2073 = vmatprep.subr.bf16.mxu0 %v2631_v57 }
 0x10a   :  { %v1781_v39 = vpop.f32.mrb[0].mxu0 }
 0x10b   :  { %v2232_v40 = vadd.f32 %v1781_v39, %v1570_v38  ;;  %v562_v41 = vpop.f32.mrb[1].mxu0 }
 0x10c   :  { %v2233_v43 = vadd.f32 %v1570_v38, %v562_v41 }
 0x10d   :  { %2261 = vtanh.f32 %v2232_v40 }
 0x10e   :  { %2263 = vtanh.f32 %v2233_v43 }
 0x117   :  { %v2262_v46 = vpop.eup %2261 }
 0x118   :  { %v2264_v49 = vpop.eup %2263  ;;  %v2665_v50 = vand.u32 4294901760, %v2262_v46 }
 0x119   :  { %v2667_v51 = vand.u32 4294901760, %v2264_v49 }
 0x11a   :  { %v689_v58 = vsub.f32 %v2262_v46, %v2665_v50 }
 0x11b   :  { %v679_v60 = vsub.f32 %v2264_v49, %v2667_v51 }
 0x11c   :  { %v690_v61 = vand.u32 4294901760, %v689_v58 }
 0x11d   :  { %1884 = vmatprep.mubr.f32.mxu1 %v679_v60  ;;  %v680_v63 = vand.u32 4294901760, %v679_v60 }
 0x11e   :  { %1885 = vmatmul.mubr.f32.vlgmr.msra.gmra.mrb[0].mxu1 %v689_v58  ;;  %v691_v6 = vsub.f32 %v689_v58, %v690_v61 }
 0x11f   :  { %2139 = vmatpush3.bf16.msra.mxu1 %v2554_v15  ;;  %1919 = vmatprep.mubr.f32.mxu1 %v680_v63  ;;  %v681_v14 = vsub.f32 %v679_v60, %v680_v63 }
 0x120   :  { %2141 = vmatprep.subr.bf16.mxu1 %v2559_v17  ;;  %v692_v21 = vand.u32 4294901760, %v691_v6 }
 0x121   :  { %v682_v16 = vand.u32 4294901760, %v681_v14 }
 0x123   :  { %2143 = vmatpush3.bf16.msra.mxu1 %v2559_v17  ;;  %1814 = vmatprep.mubr.f32.mxu0 %v682_v16 }
 0x124   :  { %1815 = vmatmul.mubr.f32.vlgmr.msra.gmra.mrb[2].mxu0 %v692_v21  ;;  %2145 = vmatprep.subr.bf16.mxu1 %v2564_v12 }
 0x125   :  { %2075 = vmatpush3.bf16.msra.mxu0 %v2631_v57  ;;  %1849 = vmatprep.mubr.f32.mxu0 %v2667_v51  ;;  %v2176_v57 = vpack.c.bf16 %v736_v59, %v729_v55 }
 0x126   :  { %2077 = vmatprep.subr.bf16.mxu0 %v2076_v19 }
 0x127   :  { %2147 = vmatpush3.bf16.msra.mxu1 %v2564_v12 }
 0x128   :  { %2149 = vmatprep.subr.bf16.mxu1 %v2568_v13 }
 0x129   :  { %2079 = vmatpush3.bf16.msra.mxu0 %v2076_v19 }
 0x12a   :  { %2081 = vmatprep.subr.bf16.mxu0 %v2080_v26 }
 0x12b   :  { %2151 = vmatpush3.bf16.msra.mxu1 %v2568_v13 }
 0x12c   :  { %2153 = vmatprep.subr.bf16.mxu1 %v2596_v29 }
 0x12d   :  { %2083 = vmatpush3.bf16.msra.mxu0 %v2080_v26 }
 0x12e   :  { %2085 = vmatprep.subr.bf16.mxu0 %v2084_v4 }
 0x12f   :  { %2155 = vmatpush3.bf16.msra.mxu1 %v2596_v29 }
 0x130   :  { %2157 = vmatprep.subr.bf16.mxu1 %v2598_v30 }
 0x131   :  { %2087 = vmatpush3.bf16.msra.mxu0 %v2084_v4 }
 0x132   :  { %2089 = vmatprep.subr.bf16.mxu0 %v2640_v3 }
 0x133   :  { %2159 = vmatpush3.bf16.msra.mxu1 %v2598_v30 }
 0x134   :  { %2161 = vmatprep.subr.bf16.mxu1 %v2616_v42 }
 0x135   :  { %2091 = vmatpush3.bf16.msra.mxu0 %v2640_v3 }
 0x136   :  { %2093 = vmatprep.subr.bf16.mxu0 %v2644_v18 }
 0x137   :  { %2163 = vmatpush3.bf16.msra.mxu1 %v2616_v42 }
 0x138   :  { %2165 = vmatprep.subr.bf16.mxu1 %v2620_v47 }
 0x139   :  { %2095 = vmatpush3.bf16.msra.mxu0 %v2644_v18 }
 0x13a   :  { %2097 = vmatprep.subr.bf16.mxu0 %v2646_v25 }
 0x13b   :  { %2167 = vmatpush3.bf16.msra.mxu1 %v2620_v47 }
 0x13c   :  { %2169 = vmatprep.subr.bf16.mxu1 %v2648_v32 }
 0x13d   :  { %2099 = vmatpush3.bf16.msra.mxu0 %v2646_v25  ;;  %v2319_v25 = vmov 839922192  }
 0x13e   :  { %1920 = vmatmul.mubr.f32.vlgmr.msra.gmra.mrb[0].mxu1 %v690_v61  ;;  %2101 = vmatprep.subr.bf16.mxu0 %v2650_v33 }
 0x13f   :  { %2171 = vmatpush3.bf16.msra.mxu1 %v2648_v32  ;;  %1954 = vmatprep.mubr.f32.mxu1 %v2667_v51  ;;  %v1355_v32 = vunpack.c.l.s4 %v2319_v25 }
 0x140   :  { %2173 = vmatprep.subr.bf16.mxu1 %v2172_v5 }
 0x141   :  { %2103 = vmatpush3.bf16.msra.mxu0 %v2650_v33  ;;  %v2320_v33 = vmov 1985246804  }
 0x143   :  { %2175 = vmatpush3.bf16.msra.mxu1 %v2172_v5 }
 0x144   :  { %1850 = vmatmul.mubr.f32.vlgmr.msra.gmra.mrb[2].mxu0 %v2665_v50  ;;  %2177 = vmatprep.subr.bf16.mxu1 %v2176_v57 }
 0x147   :  { %2179 = vmatpush3.bf16.msra.mxu1 %v2176_v57 }
 0x148   :  { %2181 = vmatprep.subr.bf16.mxu1 %v2180_v56 }
 0x14b   :  { %2183 = vmatpush3.bf16.msra.mxu1 %v2180_v56 }
 0x14c   :  { %2185 = vmatprep.subr.bf16.mxu1 %v2652_v34 }
 0x14f   :  { %2187 = vmatpush3.bf16.msra.mxu1 %v2652_v34  ;;  %v1362_v34 = vunpack.c.l.s4 %v2320_v33 }
 0x150   :  { %2189 = vmatprep.subr.bf16.mxu1 %v2654_v35 }
 0x153   :  { %2191 = vmatpush3.bf16.msra.mxu1 %v2654_v35  ;;  %v1356_v35 = vunpack.c.0.s8 %v1355_v32 }
 0x154   :  { %2193 = vmatprep.subr.bf16.mxu1 %v2656_v36 }
 0x157   :  { %2195 = vmatpush3.bf16.msra.mxu1 %v2656_v36  ;;  %v1358_v36 = vshrl.u32 %v1357_v28, 7 }
 0x158   :  { %2197 = vmatprep.subr.bf16.mxu1 %v2658_v37 }
 0x159   :  { %v1359_v38 = vsub.s32 %v1356_v35, %v1358_v36  ;;  %v1405_v61 = vsub.s32 0, %v1358_v36  ;;  %v1435_v6 = vsub.s32 1, %v1358_v36  ;;  %v1465_v14 = vsub.s32 2, %v1358_v36 }
 0x15a   :  { %v1495_v20 = vsub.s32 3, %v1358_v36 }
 0x15b   :  { %2199 = vmatpush3.bf16.msra.mxu1 %v2658_v37  ;;  %v1363_v37 = vunpack.c.0.s8 %v1362_v34 }
 0x15c   :  { %2201 = vmatprep.subr.bf16.mxu1 %v2554_v15 }
 0x15d   :  { %v1366_v39 = vsub.s32 %v1363_v37, %v1358_v36 }
 0x15e   :  { %1955 = vmatmul.mubr.f32.vlgmr.msra.gmra.mrb[0].mxu1 %v2665_v50 }
 0x15f   :  { %2203 = vmatpush3.bf16.msra.mxu1 %v2554_v15  ;;  %1989 = vmatprep.mubr.f32.mxu1 %v2667_v51 }
 0x160   :  { %2205 = vmatprep.subr.bf16.mxu1 %v2559_v17 }
 0x163   :  { %2207 = vmatpush3.bf16.msra.mxu1 %v2559_v17 }
 0x164   :  { %2209 = vmatprep.subr.bf16.mxu1 %v2564_v12 }
 0x167   :  { %2211 = vmatpush3.bf16.msra.mxu1 %v2564_v12 }
 0x168   :  { %2213 = vmatprep.subr.bf16.mxu1 %v2568_v13 }
 0x16b   :  { %2215 = vmatpush3.bf16.msra.mxu1 %v2568_v13 }
 0x16c   :  { %2217 = vmatprep.subr.bf16.mxu1 %v2596_v29 }
 0x16f   :  { %2219 = vmatpush3.bf16.msra.mxu1 %v2596_v29 }
 0x170   :  { %2221 = vmatprep.subr.bf16.mxu1 %v2598_v30 }
 0x173   :  { %2223 = vmatpush3.bf16.msra.mxu1 %v2598_v30 }
 0x174   :  { %2225 = vmatprep.subr.bf16.mxu1 %v2616_v42 }
 0x177   :  { %2227 = vmatpush3.bf16.msra.mxu1 %v2616_v42 }
 0x178   :  { %2229 = vmatprep.subr.bf16.mxu1 %v2620_v47 }
 0x17b   :  { %2231 = vmatpush3.bf16.msra.mxu1 %v2620_v47 }
 0x17e   :  { %1990 = vmatmul.mubr.f32.vlgmr.msra.gmra.mrb[0].mxu1 %v2665_v50 }
 0x217   :  { %v1851_v62 = vpop.f32.mrb[2].mxu0 }
 0x218   :  { %v845_v0 = vpop.f32.mrb[3].mxu0  ;;  %v2234_v15 = vadd.f32 %v1851_v62, %v1571_v1 }
 0x219   :  { %v2236_v17 = vadd.f32 %v1571_v1, %v845_v0 }
 0x251   :  { %v1991_v12 = vpop.f32.mrb[0].mxu1 }
 0x252   :  { %v2235_v13 = vadd.f32 %v2234_v15, %v1991_v12  ;;  %v1271_v29 = vpop.f32.mrb[1].mxu1 }
 0x253   :  { %v2237_v30 = vadd.f32 %v2236_v17, %v1271_v29 }
 0x255   :  { %1281 = vxpose.xlu0.b32.start.end [1/1] (short) (narrow) %v2237_v30, 8 }
 0x259   :  { %1313 = vxpose.xlu0.b32.start.end [1/1] (short) (narrow) %v2235_v13, 8 }
 0x2d5   :  { %v1297_v42 = vpop.trf.xlu0 }
 0x2d9   :  { %v1329_v3 = vpop.trf.xlu0 }
 0x2da   :  { %v1347_v47 = vcombine.low %v1297_v42, %v1329_v3 }
 0x2dc   :  { %v1350_v18 = vsel %vm1349_vm1, %v1347_v47, -inf }
 0x2dd   :  { %1351 = vmax.xlane.f32.xlu1 %v1350_v18 }
 0x36a   :  { %v1352_v40 = vpop.xlane.xlu1 %1351 }
 0x36b   :  { %v1360_v41 = vrot.slane %v1352_v40, %v1359_v38  ;;  %v1367_v43 = vrot.slane %v1352_v40, %v1366_v39 }
 0x36d   :  { %v1370_v44 = vsub.f32 %v1297_v42, %v1360_v41  ;;  %v1371_v45 = vsub.f32 %v1329_v3, %v1367_v43 }
 0x36f   :  { %v1372_v46 = vmul.f32 1.442695, %v1370_v44  ;;  %v1374_v49 = vmul.f32 1.442695, %v1371_v45 }
 0x371   :  { %2265 = vpow2.f32 %v1372_v46 }
 0x372   :  { %2267 = vpow2.f32 %v1374_v49 }
 0x37b   :  { %v2266_v50 = vpop.eup %2265 }
 0x37c   :  { %v2268_v51 = vpop.eup %2267 }
 0x37d   :  { %v1378_v52 = vcombine.low %v2266_v50, %v2268_v51 }
 0x37f   :  { %v1380_v53 = vsel %vm1349_vm1, %v1378_v52, 0.0 }
 0x380   :  { %1381 = vadd.xlane.f32.xlu1 %v1380_v53 }
 0x40d   :  { %v1382_v55 = vpop.xlane.xlu1 %1381 }
 0x40e   :  { %2269 = vrcp.f32 %v1382_v55 }
 0x418   :  { %v2270_v58 = vpop.eup %2269 }
 0x419   :  { %v1391_v59 = vrot.slane %v2270_v58, %v1359_v38  ;;  %v1398_v60 = vrot.slane %v2270_v58, %v1366_v39 }
 0x41b   :  { %v1401_v63 = vmul.f32 %v2266_v50, %v1391_v59  ;;  %v1402_v2 = vmul.f32 %v2268_v51, %v1398_v60 }
 0x41d   :  { %v1413_v48 = vrot.slane %v1402_v2, %v1405_v61  ;;  %v1406_v54 = vrot.slane %v1401_v63, %v1405_v61  ;;  %v1534_v9 = vcombine.low %v1401_v63, %v1402_v2  ;;  %v1436_v10 = vrot.slane %v1401_v63, %v1435_v6 }
 0x41e   :  { %v1443_v11 = vrot.slane %v1402_v2, %v1435_v6  ;;  %v1466_v16 = vrot.slane %v1401_v63, %v1465_v14  ;;  %v1473_v19 = vrot.slane %v1402_v2, %v1465_v14  ;;  %v1496_v21 = vrot.slane %v1401_v63, %v1495_v20 }
 0x41f   :  { %1415 = vbcast.lane.b32.xlu1 %v1413_v48, 256  ;;  %1408 = vbcast.lane.b32.xlu0 %v1406_v54, 256  ;;  %1536 = vst.msk [vmem:[#allocation4] sm:$0xff] %vm1349_vm1, %v1534_v9  ;;  %v1503_v22 = vrot.slane %v1402_v2, %v1495_v20 }
 0x423   :  { %1438 = vbcast.lane.b32.xlu1 %v1436_v10, 256 }
 0x427   :  { %1445 = vbcast.lane.b32.xlu1 %v1443_v11, 256 }
 0x42b   :  { %1468 = vbcast.lane.b32.xlu1 %v1466_v16, 256 }
 0x42f   :  { %1475 = vbcast.lane.b32.xlu1 %v1473_v19, 256 }
 0x433   :  { %1498 = vbcast.lane.b32.xlu1 %v1496_v21, 256 }
 0x437   :  { %1505 = vbcast.lane.b32.xlu1 %v1503_v22, 256 }
 0x438   :  { %2282 = shalt.err (!%p2279_p4)
}
 0x439   :  { %s2283_s19 = scalar_lea.hbm %s2806_s6, 128 }
 0x43a   :  { %p2284_p5 = scmp.ne.s32.totalorder %s2806_s6, %s2283_s19  ;;  %p2287_p6 = scmp.lt.u32.totalorder %s2283_s19, %s2806_s6 }
 0x43c   :  { %p2289_p7 = pnand %p2287_p6, %p2284_p5 }
 0x43e   :  { %2292 = shalt.err (!%p2289_p7)
}
 0x43f   :  { %1561 = dma.vmem_to_hbm [thread:$0]  %s1559_s15, 128, %s2806_s6, [#allocation5]   ;;  %vm1523_vm2 = vcmask 1040384   ;;  %vm1526_vm3 = vcmask 1041408   ;;  %vm1529_vm4 = vcmask 1042432  }
 0x440   :  { %s2322_s6 = smov [#allocation2]  }
 0x441   :  { %s1548_s26 = sshll.u32 %s2322_s6, 4  ;;  %s1549_s26 = int_to_ptr.vmem [resolvable:$true] %s1548_s26 }
 0x442   :  { %s2293_s27 = scalar_lea.vmem %s1549_s26, 128  ;;  %p2298_p9 = scmp.lt.s32.totalorder %s1549_s26, %s1549_s26 }
 0x443   :  { %p2294_p8 = scmp.ne.s32.totalorder %s1549_s26, %s2293_s27  ;;  %p2299_p10 = scmp.lt.s32.totalorder %s2293_s27, %s2293_s27 }
 0x445   :  { %p2300_p11 = por %p2299_p10, %p2298_p9 }
 0x447   :  { %p2301_p12 = pnand %p2300_p11, %p2294_p8 }
 0x491   :  { %v1416_v23 = vpop.permute.xlu1 %1415  ;;  %v1409_v26 = vpop.permute.xlu0 %1408 }
 0x492   :  { %v1418_v4 = vmul.f32 %v1416_v23, %v2378_v8  ;;  %v1417_v5 = vmul.f32 %v1409_v26, %v2373_v7 }
 0x494   :  { %v1426_v1 = vsel %vm37_vm0, %v1418_v4, 0.0  ;;  %v1419_v15 = vsel %vm37_vm0, %v1417_v5, 0.0 }
 0x495   :  { %v1439_v24 = vpop.permute.xlu1 %1438  ;;  %v1427_v30 = vrot.slane %v1426_v1, 4  ;;  %v1420_v42 = vrot.slane %v1419_v15, 4 }
 0x496   :  { %v1447_v31 = vmul.f32 %v1439_v24, %v2373_v7 }
 0x497   :  { %v1428_v34 = vadd.f32 %v1427_v30, %v1426_v1  ;;  %v1421_v35 = vadd.f32 %v1420_v42, %v1419_v15 }
 0x498   :  { %v1449_v56 = vsel %vm37_vm0, %v1447_v31, 0.0 }
 0x499   :  { %v1446_v27 = vpop.permute.xlu1 %1445  ;;  %v1450_v12 = vrot.slane %v1449_v56, 4  ;;  %v1429_v45 = vrot.slane %v1428_v34, 2  ;;  %v1422_v46 = vrot.slane %v1421_v35, 2 }
 0x49a   :  { %v1448_v57 = vmul.f32 %v1446_v27, %v2378_v8 }
 0x49b   :  { %v1451_v25 = vadd.f32 %v1450_v12, %v1449_v56  ;;  %v1430_v61 = vadd.f32 %v1429_v45, %v1428_v34  ;;  %v1423_v63 = vadd.f32 %v1422_v46, %v1421_v35 }
 0x49c   :  { %v1456_v62 = vsel %vm37_vm0, %v1448_v57, 0.0 }
 0x49d   :  { %v1469_v0 = vpop.permute.xlu1 %1468  ;;  %v1457_v13 = vrot.slane %v1456_v62, 4  ;;  %v1452_v39 = vrot.slane %v1451_v25, 2  ;;  %v1431_v16 = vrot.slane %v1430_v61, 1  ;;  %v1424_v19 = vrot.slane %v1423_v63, 1 }
 0x49e   :  { %v1477_v17 = vmul.f32 %v1469_v0, %v2373_v7 }
 0x49f   :  { %v1458_v32 = vadd.f32 %v1457_v13, %v1456_v62  ;;  %v1453_v53 = vadd.f32 %v1452_v39, %v1451_v25  ;;  %v1432_v31 = vadd.f32 %v1431_v16, %v1430_v61  ;;  %v1425_v27 = vadd.f32 %v1424_v19, %v1423_v63 }
 0x4a0   :  { %v1479_v29 = vsel %vm37_vm0, %v1477_v17, 0.0 }
 0x4a1   :  { %v1480_v3 = vrot.slane %v1479_v29, 4  ;;  %v1476_v47 = vpop.permute.xlu1 %1475  ;;  %v1459_v40 = vrot.slane %v1458_v32, 2  ;;  %v1454_v54 = vrot.slane %v1453_v53, 1 }
 0x4a2   :  { %v1478_v18 = vmul.f32 %v1476_v47, %v2378_v8 }
 0x4a3   :  { %v1481_v28 = vadd.f32 %v1480_v3, %v1479_v29  ;;  %v1460_v55 = vadd.f32 %v1459_v40, %v1458_v32  ;;  %v1455_v21 = vadd.f32 %v1454_v54, %v1453_v53 }
 0x4a4   :  { %v1486_v33 = vsel %vm37_vm0, %v1478_v18, 0.0 }
 0x4a5   :  { %v1487_v36 = vrot.slane %v1486_v33, 4  ;;  %v1499_v37 = vpop.permute.xlu1 %1498  ;;  %v1482_v43 = vrot.slane %v1481_v28, 2  ;;  %v1461_v6 = vrot.slane %v1460_v55, 1  ;;  %v1524_v56 = vsel %vm1523_vm2, %v1425_v27, %v1455_v21 }
 0x4a6   :  { %v1507_v38 = vmul.f32 %v1499_v37, %v2373_v7 }
 0x4a7   :  { %v1488_v41 = vadd.f32 %v1487_v36, %v1486_v33  ;;  %v1483_v59 = vadd.f32 %v1482_v43, %v1481_v28  ;;  %v1462_v22 = vadd.f32 %v1461_v6, %v1460_v55 }
 0x4a8   :  { %v1509_v44 = vsel %vm37_vm0, %v1507_v38, 0.0 }
 0x4a9   :  { %v1489_v49 = vrot.slane %v1488_v41, 2  ;;  %v1510_v50 = vrot.slane %v1509_v44, 4  ;;  %v1506_v51 = vpop.permute.xlu1 %1505  ;;  %v1484_v11 = vrot.slane %v1483_v59, 1  ;;  %v1525_v62 = vsel %vm1523_vm2, %v1432_v31, %v1462_v22 }
 0x4aa   :  { %v1508_v52 = vmul.f32 %v1506_v51, %v2378_v8 }
 0x4ab   :  { %v1511_v58 = vadd.f32 %v1510_v50, %v1509_v44  ;;  %v1490_v60 = vadd.f32 %v1489_v49, %v1488_v41  ;;  %v1485_v24 = vadd.f32 %v1484_v11, %v1483_v59 }
 0x4ac   :  { %v1516_v7 = vsel %vm37_vm0, %v1508_v52, 0.0 }
 0x4ad   :  { %v1512_v2 = vrot.slane %v1511_v58, 2  ;;  %v1517_v48 = vrot.slane %v1516_v7, 4  ;;  %v1491_v14 = vrot.slane %v1490_v60, 1  ;;  %v1527_v0 = vsel %vm1526_vm3, %v1524_v56, %v1485_v24 }
 0x4af   :  { %v1513_v9 = vadd.f32 %v1512_v2, %v1511_v58  ;;  %v1518_v10 = vadd.f32 %v1517_v48, %v1516_v7  ;;  %v1492_v26 = vadd.f32 %v1491_v14, %v1490_v60 }
 0x4b1   :  { %v1514_v8 = vrot.slane %v1513_v9, 1  ;;  %v1519_v20 = vrot.slane %v1518_v10, 2  ;;  %v1528_v1 = vsel %vm1526_vm3, %v1525_v62, %v1492_v26 }
 0x4b3   :  { %v1520_v23 = vadd.f32 %v1519_v20, %v1518_v10  ;;  %v1515_v4 = vadd.f32 %v1514_v8, %v1513_v9 }
 0x4b5   :  { %v1521_v5 = vrot.slane %v1520_v23, 1  ;;  %v1530_v15 = vsel %vm1529_vm4, %v1527_v0, %v1515_v4 }
 0x4b7   :  { %v1522_v57 = vadd.f32 %v1521_v5, %v1520_v23 }
 0x4b9   :  { %v1531_v17 = vsel %vm1529_vm4, %v1528_v1, %v1522_v57 }
 0x4ba   :  { %v1539_v12 = vcombine.low %v1530_v15, %v1531_v17 }
 0x4bc   :  { %1541 = vst.msk [vmem:[#allocation2] sm:$0xff] %vm37_vm0, %v1539_v12 }
 0x4bd   :  { %2304 = shalt.err (!%p2301_p12)
}
 0x4be   :  { %s2305_s30 = scalar_lea.hbm %s2805_s5, 128 }
 0x4bf   :  { %p2306_p13 = scmp.ne.s32.totalorder %s2805_s5, %s2305_s30  ;;  %p2309_p0 = scmp.lt.u32.totalorder %s2305_s30, %s2805_s5 }
 0x4c1   :  { %p2311_p1 = pnand %p2309_p0, %p2306_p13 }
 0x4c3   :  { %2314 = shalt.err (!%p2311_p1)
}
 0x4c4   :  { %1551 = dma.vmem_to_hbm [thread:$0]  %s1549_s26, 128, %s2805_s5, [#allocation3]  }
 0x4c5   :  { %2315 = dma.done.wait [#allocation3], 128  }
 0x4c6   :  { %2316 = vsyncadd [#allocation3], 4294967168 }
 0x4c7   :  { %2317 = dma.done.wait [#allocation5], 128  }
 0x4c8   :  { %2318 = vsyncadd [#allocation5], 4294967168 }
 0x4c9   :  { %1568 = vsyncpa [#allocation3], 1 }
 0x4ca   :  { %1569 = vsyncpa [#allocation5], 1 }

</bundles_post_ra>
